<compile_context>
chip_gen: v5e
topology: v5e:2x2
jax: 0.10.0
libtpu: 0.0.40
codegen_flags: <defaults>
</compile_context>

<pallas_src>
import math

import jax
import jax.numpy as jnp
from jax.experimental import pallas as pl
from jax.experimental.pallas import tpu as pltpu


def _round_up(x, m):
    return ((x + m - 1) // m) * m


def mlp_critic_kernel(x_ref, w1_ref, b1_ref, w2_ref, b2_ref, w3_ref, b3_ref, o_ref):
    # x_ref:  (obs_dim, tile_b) bf16   -- batch on lanes
    # w1_ref: (h1, obs_dim) bf16, b1_ref: (h1, 1) f32
    # w2_ref: (h2, h1)      bf16, b2_ref: (h2, 1) f32
    # w3_ref: (h2, 1) f32,        b3_ref: (1, 1)  f32
    # o_ref:  (1, tile_b) f32          -- lane-dense output block

    # Layer 1: bf16 MXU matmul, f32 accumulate, f32 bias + tanh (bias lane-broadcasts).
    h = jnp.tanh(
        jnp.dot(w1_ref[...], x_ref[...], preferred_element_type=jnp.float32)
        + b1_ref[...]
    )
    # Layer 2: cast activations back to bf16 for the MXU; accumulate/tanh in f32.
    h = jnp.tanh(
        jnp.dot(w2_ref[...], h.astype(jnp.bfloat16), preferred_element_type=jnp.float32)
        + b2_ref[...]
    )
    # Output layer (out_features = 1): VPU broadcast-multiply + XLU sublane reduce
    # instead of an MXU matmul that would use a single MXU row.
    o_ref[...] = jnp.sum(h * w3_ref[...], axis=0, keepdims=True) + b3_ref[...]


def prepare_params(params):
    """Cast weights to bf16 once (cacheable across rollout steps); biases stay f32."""
    w1, b1, w2, b2, w3, b3 = params
    bf = jnp.bfloat16
    return (
        w1.astype(bf),            # (h1, obs_dim)
        b1,                       # (h1, 1) f32
        w2.astype(bf),            # (h2, h1)
        b2,                       # (h2, 1) f32
        w3.reshape(-1, 1),        # (h2, 1) f32 -- used on the VPU, keep f32
        b3.reshape(1, 1),         # (1, 1)  f32
    )


def mlp_critic_forward(obs, prepared_params, *, block_b=4096):
    """obs: [B, obs_dim] float32 -> [B] float32 value estimates."""
    w1, b1, w2, b2, w3, b3 = prepared_params
    B, obs_dim = obs.shape
    h1 = w1.shape[0]
    h2 = w2.shape[0]

    # Batch lives on the lane axis -> tiles are multiples of 128.
    # >= 2 grid steps so the "parallel" axis shards across v7x's two TensorCores;
    # tile sized from cdiv(B, num_tiles) to avoid up-to-2x padding amplification.
    num_tiles = max(2, pl.cdiv(B, block_b))
    tile_b = _round_up(pl.cdiv(B, num_tiles), 128)
    b_pad = num_tiles * tile_b

    # Single fused producer: zero-pad + transpose + f32->bf16 cast (one pass over obs).
    obs_t = jnp.pad(obs, ((0, b_pad - B), (0, 0))).T.astype(jnp.bfloat16)

    def resident(shape):
        # Full-array block whose block index never changes -> stays resident in VMEM.
        return pl.BlockSpec(shape, lambda i: (0, 0))

    out = pl.pallas_call(
        mlp_critic_kernel,
        out_shape=jax.ShapeDtypeStruct((1, b_pad), jnp.float32),
        grid=(num_tiles,),
        in_specs=[
            pl.BlockSpec((obs_dim, tile_b), lambda i: (0, i)),  # streamed obs tiles
            resident((h1, obs_dim)),
            resident((h1, 1)),
            resident((h2, h1)),
            resident((h2, 1)),
            resident((h2, 1)),
            resident((1, 1)),
        ],
        out_specs=pl.BlockSpec((1, tile_b), lambda i: (0, i)),   # lane-dense output
        compiler_params=pltpu.CompilerParams(
            dimension_semantics=("parallel",),
            vmem_limit_bytes=32 * 1024 * 1024,
        ),
    )(obs_t, w1, b1, w2, b2, w3, b3)

    # torch.squeeze(v, -1) -> take the single output row; drop pad columns.
    return out[0, :B]


def init_params(key, obs_dim, hidden_sizes):
    """PyTorch-layout params: weight (out, in), bias (out, 1); nn.Linear default init."""
    sizes = [obs_dim] + list(hidden_sizes) + [1]
    params = []
    for j in range(len(sizes) - 1):
        key, kw, kb = jax.random.split(key, 3)
        bound = 1.0 / math.sqrt(sizes[j])
        w = jax.random.uniform(
            kw, (sizes[j + 1], sizes[j]), jnp.float32, minval=-bound, maxval=bound
        )
        b = jax.random.uniform(
            kb, (sizes[j + 1], 1), jnp.float32, minval=-bound, maxval=bound
        )
        params += [w, b]
    return tuple(params)


def reference_forward_bf16(obs, params):
    """Pure-JAX reference matching the kernel's bf16-operand / f32-accumulate math."""
    w1, b1, w2, b2, w3, b3 = params
    bf = jnp.bfloat16
    xT = obs.astype(bf).T
    h = jnp.tanh(jnp.dot(w1.astype(bf), xT, preferred_element_type=jnp.float32) + b1)
    h = jnp.tanh(
        jnp.dot(w2.astype(bf), h.astype(bf), preferred_element_type=jnp.float32) + b2
    )
    v = jnp.sum(h * w3.reshape(-1, 1), axis=0, keepdims=True) + b3.reshape(1, 1)
    return v[0, :]


def reference_forward_f32(obs, params):
    """Full-precision reference (loose-tolerance sanity check for the bf16 path)."""
    w1, b1, w2, b2, w3, b3 = params
    h = jnp.tanh(obs @ w1.T + b1.reshape(1, -1))
    h = jnp.tanh(h @ w2.T + b2.reshape(1, -1))
    v = h @ w3.T + b3.reshape(1, -1)
    return v[:, 0]


if __name__ == "__main__":
    OBS_DIM = 16
    HIDDEN_SIZES = (32, 32)  # Tanh activation (typical for TRPO critics)

    key = jax.random.PRNGKey(0)
    key_obs, key_obs2, key_params = jax.random.split(key, 3)
    params = init_params(key_params, OBS_DIM, HIDDEN_SIZES)
    prepared = prepare_params(params)  # bf16 weight cast done once, reused below

    # Small case.
    B = 8
    obs = jax.random.normal(key_obs, (B, OBS_DIM), jnp.float32)
    v = jax.block_until_ready(mlp_critic_forward(obs, prepared))
    v_ref = jax.block_until_ready(reference_forward_bf16(obs, params))
    v_f32 = jax.block_until_ready(reference_forward_f32(obs, params))
    assert v.shape == (B,), f"unexpected output shape {v.shape}"
    assert jnp.allclose(v, v_ref, atol=1e-4, rtol=1e-4), "mismatch vs bf16 reference"
    assert jnp.allclose(v, v_f32, atol=5e-2, rtol=5e-2), "mismatch vs f32 reference"

    # Ragged case (exercises batch padding / multi-tile grid).
    B2 = 37
    obs2 = jax.random.normal(key_obs2, (B2, OBS_DIM), jnp.float32)
    v2 = jax.block_until_ready(mlp_critic_forward(obs2, prepared))
    v2_ref = jax.block_until_ready(reference_forward_bf16(obs2, params))
    assert v2.shape == (B2,), f"unexpected output shape {v2.shape}"
    assert jnp.allclose(v2, v2_ref, atol=1e-4, rtol=1e-4), "mismatch vs bf16 reference"

    print("KERNEL_OK")
</pallas_src>

<mosaic_0001>
module attributes {stable_mosaic.version = 11 : i64} {
  func.func @mlp_critic_kernel(%arg0: i32, %arg1: memref<16x128xbf16, #tpu.memory_space<vmem>>, %arg2: memref<32x16xbf16, #tpu.memory_space<vmem>>, %arg3: memref<32x1xf32, #tpu.memory_space<vmem>>, %arg4: memref<32x32xbf16, #tpu.memory_space<vmem>>, %arg5: memref<32x1xf32, #tpu.memory_space<vmem>>, %arg6: memref<32x1xf32, #tpu.memory_space<vmem>>, %arg7: memref<1x1xf32, #tpu.memory_space<vmem>>, %arg8: memref<1x128xf32, #tpu.memory_space<vmem>>) attributes {dimension_semantics = [#tpu.dimension_semantics<parallel>], iteration_bounds = array<i64: 2>, scalar_prefetch = 0 : i64, scratch_operands = 0 : i64, tpu.core_type = #tpu.core_type<tc>, window_params = [{transform_indices = @transform_0, window_bounds = array<i64: 16, 128>}, {pipeline_mode = #tpu.pipeline_mode<synchronous>, transform_indices = @transform_1, window_bounds = array<i64: 32, 16>}, {pipeline_mode = #tpu.pipeline_mode<synchronous>, transform_indices = @transform_2, window_bounds = array<i64: 32, 1>}, {pipeline_mode = #tpu.pipeline_mode<synchronous>, transform_indices = @transform_3, window_bounds = array<i64: 32, 32>}, {pipeline_mode = #tpu.pipeline_mode<synchronous>, transform_indices = @transform_4, window_bounds = array<i64: 32, 1>}, {pipeline_mode = #tpu.pipeline_mode<synchronous>, transform_indices = @transform_5, window_bounds = array<i64: 32, 1>}, {pipeline_mode = #tpu.pipeline_mode<synchronous>, transform_indices = @transform_6, window_bounds = array<i64: 1, 1>}, {transform_indices = @transform_7, window_bounds = array<i64: 1, 128>}]} {
    %c0 = arith.constant 0 : index
    %c0_0 = arith.constant 0 : index
    %0 = vector.load %arg2[%c0, %c0_0] : memref<32x16xbf16, #tpu.memory_space<vmem>>, vector<32x16xbf16>
    %c0_1 = arith.constant 0 : index
    %c0_2 = arith.constant 0 : index
    %1 = vector.load %arg1[%c0_1, %c0_2] : memref<16x128xbf16, #tpu.memory_space<vmem>>, vector<16x128xbf16>
    %cst = arith.constant dense<0.000000e+00> : vector<32x128xf32>
    %2 = tpu.matmul %0, %1, %cst {dimension_numbers = #tpu.dot_dimension_numbers<[1], [0], [0], [1], [0, 0, 1, 1], [], []>} : vector<32x16xbf16>, vector<16x128xbf16>, vector<32x128xf32> -> vector<32x128xf32>
    %c0_3 = arith.constant 0 : index
    %c0_4 = arith.constant 0 : index
    %3 = vector.load %arg3[%c0_3, %c0_4] : memref<32x1xf32, #tpu.memory_space<vmem>>, vector<32x1xf32>
    %4 = vector.broadcast %3 : vector<32x1xf32> to vector<32x128xf32>
    %5 = arith.addf %2, %4 : vector<32x128xf32>
    %6 = math.tanh %5 : vector<32x128xf32>
    %c0_5 = arith.constant 0 : index
    %c0_6 = arith.constant 0 : index
    %7 = vector.load %arg4[%c0_5, %c0_6] : memref<32x32xbf16, #tpu.memory_space<vmem>>, vector<32x32xbf16>
    %8 = arith.truncf %6 : vector<32x128xf32> to vector<32x128xbf16>
    %cst_7 = arith.constant dense<0.000000e+00> : vector<32x128xf32>
    %9 = tpu.matmul %7, %8, %cst_7 {dimension_numbers = #tpu.dot_dimension_numbers<[1], [0], [0], [1], [0, 0, 1, 1], [], []>} : vector<32x32xbf16>, vector<32x128xbf16>, vector<32x128xf32> -> vector<32x128xf32>
    %c0_8 = arith.constant 0 : index
    %c0_9 = arith.constant 0 : index
    %10 = vector.load %arg5[%c0_8, %c0_9] : memref<32x1xf32, #tpu.memory_space<vmem>>, vector<32x1xf32>
    %11 = vector.broadcast %10 : vector<32x1xf32> to vector<32x128xf32>
    %12 = arith.addf %9, %11 : vector<32x128xf32>
    %13 = math.tanh %12 : vector<32x128xf32>
    %c0_10 = arith.constant 0 : index
    %c0_11 = arith.constant 0 : index
    %14 = vector.load %arg6[%c0_10, %c0_11] : memref<32x1xf32, #tpu.memory_space<vmem>>, vector<32x1xf32>
    %15 = vector.broadcast %14 : vector<32x1xf32> to vector<32x128xf32>
    %16 = arith.mulf %13, %15 : vector<32x128xf32>
    %cst_12 = arith.constant dense<0.000000e+00> : vector<128xf32>
    %17 = vector.multi_reduction <add>, %16, %cst_12 [0] : vector<32x128xf32> to vector<128xf32>
    %18 = vector.shape_cast %17 : vector<128xf32> to vector<1x128xf32>
    %c0_13 = arith.constant 0 : index
    %c0_14 = arith.constant 0 : index
    %19 = vector.load %arg7[%c0_13, %c0_14] : memref<1x1xf32, #tpu.memory_space<vmem>>, vector<1x1xf32>
    %20 = vector.broadcast %19 : vector<1x1xf32> to vector<1x128xf32>
    %21 = arith.addf %18, %20 : vector<1x128xf32>
    %c0_15 = arith.constant 0 : index
    %c0_16 = arith.constant 0 : index
    %22 = vector.load %arg8[%c0_15, %c0_16] : memref<1x128xf32, #tpu.memory_space<vmem>>, vector<1x128xf32>
    tpu.vector_store %arg8[%c0_15, %c0_16], %21 {strides = array<i32>} : memref<1x128xf32, #tpu.memory_space<vmem>>, vector<1x128xf32>,
    return
  }
  func.func @transform_0(%arg0: i32) -> (i32, i32) {
    %c0_i32 = arith.constant 0 : i32
    %c0_i32_0 = arith.constant 0 : i32
    return %c0_i32, %arg0 : i32, i32
  }
  func.func @transform_1(%arg0: i32) -> (i32, i32) {
    %c0_i32 = arith.constant 0 : i32
    %c0_i32_0 = arith.constant 0 : i32
    %c0_i32_1 = arith.constant 0 : i32
    return %c0_i32, %c0_i32_0 : i32, i32
  }
  func.func @transform_2(%arg0: i32) -> (i32, i32) {
    %c0_i32 = arith.constant 0 : i32
    %c0_i32_0 = arith.constant 0 : i32
    %c0_i32_1 = arith.constant 0 : i32
    return %c0_i32, %c0_i32_0 : i32, i32
  }
  func.func @transform_3(%arg0: i32) -> (i32, i32) {
    %c0_i32 = arith.constant 0 : i32
    %c0_i32_0 = arith.constant 0 : i32
    %c0_i32_1 = arith.constant 0 : i32
    return %c0_i32, %c0_i32_0 : i32, i32
  }
  func.func @transform_4(%arg0: i32) -> (i32, i32) {
    %c0_i32 = arith.constant 0 : i32
    %c0_i32_0 = arith.constant 0 : i32
    %c0_i32_1 = arith.constant 0 : i32
    return %c0_i32, %c0_i32_0 : i32, i32
  }
  func.func @transform_5(%arg0: i32) -> (i32, i32) {
    %c0_i32 = arith.constant 0 : i32
    %c0_i32_0 = arith.constant 0 : i32
    %c0_i32_1 = arith.constant 0 : i32
    return %c0_i32, %c0_i32_0 : i32, i32
  }
  func.func @transform_6(%arg0: i32) -> (i32, i32) {
    %c0_i32 = arith.constant 0 : i32
    %c0_i32_0 = arith.constant 0 : i32
    %c0_i32_1 = arith.constant 0 : i32
    return %c0_i32, %c0_i32_0 : i32, i32
  }
  func.func @transform_7(%arg0: i32) -> (i32, i32) {
    %c0_i32 = arith.constant 0 : i32
    %c0_i32_0 = arith.constant 0 : i32
    return %c0_i32, %arg0 : i32, i32
  }
}

</mosaic_0001>

<bundles_post_ra>
// kernel: tpu_custom_call.1
= control target key start
LH: loop header
LB: loop body
LE: loop exit
PB: predicated region body
PF: predicated region fallthrough
CT: control target
= control target key end

     0   :  { %s943_s0 = inlined_call_operand.vmem [shape: bf16[16,256], index: 0, kind: input, shape index: {}]   ;;  %s944_s1 = inlined_call_operand.vmem [shape: bf16[32,16], index: 1, kind: input, shape index: {}]   ;;  %s945_s2 = inlined_call_operand.vmem [shape: f32[32,1], index: 2, kind: input, shape index: {}]   ;;  %s946_s3 = inlined_call_operand.vmem [shape: bf16[32,32], index: 3, kind: input, shape index: {}]   ;;  %s947_s4 = inlined_call_operand.vmem [shape: f32[32,1], index: 4, kind: input, shape index: {}]   ;;  %s948_s5 = inlined_call_operand.vmem [shape: f32[32,1], index: 5, kind: input, shape index: {}]   ;;  %s949_s6 = inlined_call_operand.<no memory space> [shape: f32[1,1], index: 6, kind: input, shape index: {}]   ;;  %s950_s7 = inlined_call_operand.hbm [shape: f32[1,256], index: 7, kind: output, shape index: {}]  }
   0x1   :  { %v12_v0 = vstv %s949_s6 }
   0x2   :  { %13 = vst [vmem:[#allocation2] sm:$0x1] %v12_v0 }
   0x3   :  { %14 = vsyncpa [#allocation5], 0 }
   0x4   :  { %16 = vsyncpa [#allocation5 + $0x1], 0  ;;  %s800_s26 = smov 0   ;;  %s802_s27 = smov 0  }
   0x5   :  { %s804_s28 = smov 0   ;;  %s806_s29 = smov 0  }
   0x6 LB: > { %s591_s6 = sadd.s32 4294967295, %s754_s29   ;;  %s592_s30 = sadd.s32 4294967294, %s754_s29   ;;  %s754_s29 = sphi %s806_s29, %s956_s29   ;;  %s750_s28 = sphi %s804_s28, %s955_s28   ;;  %s746_s27 = sphi %s802_s27, %s954_s27   ;;  %s742_s26 = sphi %s800_s26, %s953_s26  }
   0x7   : > { %s823_s8 = sadd.s32 1, %s754_s29   ;;  %s29_s9 = sadd.s32 1, %s750_s28 }
   0x8   : > { %s26_s10 = ssub.s32 %s754_s29, %s823_s8  ;;  %p36_p0 = scmp.ne.s32.totalorder %s750_s28, %s746_s27 }
   0x9   : > { %p27_p1 = scmp.eq.s32.totalorder %s26_s10, 0  ;;  %p37_p2 = scmp.eq.s32.totalorder %s754_s29, 0 }
   0xa   : > { %p192_p3 = scmp.eq.s32.totalorder %s591_s6, 1  ;;  %p197_p4 = scmp.ne.s32.totalorder %s746_s27, %s742_s26 }
   0xb   : > { %s836_s11 = scalar_select %p27_p1, %s750_s28, %s29_s9  }
   0xc   : > { %p38_p5 = por %p37_p2, %p36_p0  ;;  %p838_p6 = por %p192_p3, %p36_p0 }
   0xd   : > { %p198_p7 = scmp.eq.s32.totalorder %s592_s30, 1  ;;  %p594_p9 = scmp.ge.s32.totalorder %s754_s29, 2 }
   0xf   : > { %p842_p8 = por %p198_p7, %p197_p4  ;;  %232 = sbr.rel (%p594_p9) target bundleno = 26 (0x1a), region = 40 }
  0x14   : > { %235 = sbr.rel (!%p38_p5) target bundleno = 26 (0x1a), region = 44  ;;  %s237_s14 = sand.u32 (%p38_p5), 1, %s750_s28  }
  0x15   : > { %s596_s15 = sshll.u32 (%p38_p5), %s754_s29, 2  ;;  %s595_s16 = sshll.u32 (%p38_p5), %s237_s14, 3 }
  0x16   : > { %s241_s19 = scalar_lea.vmem (%p38_p5), %s943_s0, %s596_s15  ;;  %s239_s20 = scalar_lea.vmem (%p38_p5), [#allocation3], %s595_s16 }
  0x17   : > { %v258_v1 = vld [vmem:[%s241_s19] sm:$0xf] (%p38_p5)  ;;  %v260_v2 = vld [vmem:[%s241_s19 + $0x8] sm:$0xf] (%p38_p5) }
  0x18   : > { %259 = vst [vmem:[%s239_s20] sm:$0xf] (%p38_p5), %v258_v1 }
  0x19   : > { %261 = vst [vmem:[%s239_s20 + $0x4] sm:$0xf] %v260_v2 }
  0x1a PF: > { %p597_p10 = scmp.ge.s32.totalorder %s754_s29, 1  ;;  %p288_p11 = scmp.lt.s32.totalorder %s754_s29, 3 }
  0x1c   : > { %p289_p12 = pnand %p597_p10, %p288_p11 }
  0x1d   : > { %s863_s25 = sand.u32 (!%p289_p12), 1, %s746_s27   ;;  %s527_s15 = scalar_lea.hbm (!%p289_p12), %s950_s7, %s591_s6 }
  0x1e   : > { %292 = sbr.rel (%p289_p12) target bundleno = 369 (0x171), region = 85  ;;  %s598_s30 = sshll.u32 (!%p289_p12), %s863_s25, 3 }
  0x1f   : > { %s297_s9 = scalar_lea.vmem (!%p289_p12), [#allocation3], %s598_s30  ;;  %s324_s16 = scalar_lea.vmem (!%p289_p12), [#allocation4], %s863_s25 }
  0x20   : > { %s529_s17 = sshll.u32 (!%p289_p12), %s324_s16, 4  ;;  %s531_s18 = sshll.u32 (!%p289_p12), %s527_s15, 4  ;;  %s530_s17 = int_to_ptr.vmem [resolvable:$true] %s529_s17  ;;  %s532_s18 = int_to_ptr.hbm [resolvable:$true] %s531_s18 }
  0x21   : > { %s519_s19 = scalar_lea.sflag (!%p289_p12), [#allocation5], %s863_s25  ;;  %s706_s20 = sshra.s32 (!%p289_p12), %s532_s18, 4  ;;  %s707_s20 = int_to_ptr.hbm [resolvable:$true] %s706_s20 }
  0x22   : > { %s708_s21 = scalar_lea.hbm (!%p289_p12), %s707_s20, 1  ;;  %s712_s23 = scalar_lea.hbm (!%p289_p12), %s950_s7, 2 }
  0x23   : > { %v334_v3 = vld [vmem:[%s945_s2 + $0x10] sm:$0xff]  ;;  %v332_v4 = vld [vmem:[%s945_s2] sm:$0xff]  ;;  %v756_v5 = vmov 0   ;;  %v626_v7 = vld [vmem:[%s944_s1 + $0x8] sm:$0xff]  ;;  %vm372_vm0 = vcmask 130048   ;;  %vm442_vm1 = vcmask 261120   ;;  %p709_p13 = scmp.ne.s32.totalorder %s707_s20, %s708_s21  ;;  %p713_p2 = scmp.lt.s32.totalorder %s707_s20, %s950_s7 }
  0x24   : > { %673 = vset.pattern.permute.xlu0 %v756_v5  ;;  %674 = vset.pattern.permute.xlu1 %v756_v5  ;;  %v627_v6 = vld [vmem:[%s297_s9] sm:$0xff]  ;;  %v335_v9 = vld [vmem:[%s945_s2 + $0x18] sm:$0xff]  ;;  %v509_v15 = vld [vmem:[#allocation2] sm:$0x1]  ;;  %p714_p3 = scmp.lt.s32.totalorder %s712_s23, %s708_s21 }
  0x25   : > { %348 = vperm.xlu0 %673, %v334_v3   ;;  %338 = vperm.xlu1 %674, %v332_v4   ;;  %v625_v8 = vld [vmem:[%s944_s1] sm:$0xff]  ;;  %v333_v10 = vld [vmem:[%s945_s2 + $0x8] sm:$0xff]  ;;  %v410_v11 = vld [vmem:[%s947_s4 + $0x10] sm:$0xff]  ;;  %p710_p0 = pnand %p709_p13, %p838_p6 }
  0x26   : > { %675 = vset.pattern.permute.xlu2 %v756_v5  ;;  %630 = vmatpush.bf16.msra.mxu3 %v627_v6  ;;  %v411_v12 = vld [vmem:[%s947_s4 + $0x18] sm:$0xff]  ;;  %v473_v13 = vld [vmem:[%s948_s5 + $0x8] sm:$0xff]  ;;  %v474_v14 = vld [vmem:[%s948_s5 + $0x10] sm:$0xff]  ;;  %p715_p4 = por %p714_p3, %p713_p2 }
  0x27   : > { %386 = vmatpush.bf16.msra.mxu0 %v627_v6  ;;  %v408_v16 = vld [vmem:[%s947_s4] sm:$0xff]  ;;  %v409_v21 = vld [vmem:[%s947_s4 + $0x8] sm:$0xff]  ;;  %v475_v35 = vld [vmem:[%s948_s5 + $0x18] sm:$0xff]  ;;  %p711_p1 = pneg %p710_p0 }
  0x28   : > { %414 = vperm.xlu2 %675, %v408_v16   ;;  %v472_v30 = vld [vmem:[%s948_s5] sm:$0xff]  ;;  %v629_v39 = vld [vmem:[%s946_s3 + $0x8] sm:$0xff] }
  0x29   : > { %612 = vmatmul.msk.bf16.vlgmr.msra.gmra.mxu3 %vm372_vm0, %v626_v7  ;;  %v628_v38 = vld [vmem:[%s946_s3] sm:$0xff]  ;;  %p716_p5 = pnand %p715_p4, %p711_p1 }
  0x2a   : > { %611 = vmatmul.msk.bf16.vlgmr.msra.gmra.mxu0 %vm372_vm0, %v625_v8 }
  0x2d   : > { %353 = vperm.xlu0 %673, %v335_v9   ;;  %343 = vperm.xlu1 %674, %v333_v10  }
  0x30   : > { %419 = vperm.xlu2 %675, %v409_v21  }
  0x35   : > { %424 = vperm.xlu0 %673, %v410_v11   ;;  %429 = vperm.xlu1 %674, %v411_v12  }
  0x38   : > { %478 = vperm.xlu2 %675, %v472_v30  }
  0x3d   : > { %483 = vperm.xlu0 %673, %v473_v13   ;;  %488 = vperm.xlu1 %674, %v474_v14  }
  0x40   : > { %493 = vperm.xlu2 %675, %v475_v35  }
  0x45   : > { %512 = vperm.xlu0 %673, %v509_v15  }
  0x82   : > { %v415_v40 = vpop.permute.xlu2 %414 }
  0x8a   : > { %v420_v42 = vpop.permute.xlu2 %419 }
  0x92   : > { %v479_v50 = vpop.permute.xlu2 %478 }
  0x97   : > { %v349_v18 = vpop.permute.xlu0 %348  ;;  %v339_v19 = vpop.permute.xlu1 %338 }
  0x9a   : > { %v494_v63 = vpop.permute.xlu2 %493 }
  0x9f   : > { %v354_v24 = vpop.permute.xlu0 %353  ;;  %v344_v25 = vpop.permute.xlu1 %343 }
  0xa7   : > { %v388_v17 = vpop.f32.mrf.mxu0  ;;  %v425_v45 = vpop.permute.xlu0 %424 }
  0xa8   : > { %v389_v26 = vadd.f32 %v388_v17, %v339_v19  ;;  %v430_v49 = vpop.permute.xlu1 %429 }
  0xac   : > { %v393_v20 = vpop.f32.mrf.mxu3 }
  0xad   : > { %v394_v22 = vadd.f32 %v393_v20, %v349_v18 }
  0xaf   : > { %v390_v23 = vpop.f32.mrf.mxu0  ;;  %676 = vtanh.f32 %v394_v22  ;;  %v484_v55 = vpop.permute.xlu0 %483 }
  0xb0   : > { %v391_v28 = vadd.f32 %v390_v23, %v344_v25  ;;  %v489_v60 = vpop.permute.xlu1 %488 }
  0xb4   : > { %v395_v27 = vpop.f32.mrf.mxu3 }
  0xb5   : > { %v396_v29 = vadd.f32 %v395_v27, %v354_v24  ;;  %v677_v31 = vpop.eup %676 }
  0xb7   : > { %678 = vtanh.f32 %v396_v29  ;;  %v513_v7 = vpop.permute.xlu0 %512 }
  0xb8   : > { %680 = vtanh.f32 %v389_v26  ;;  %v515_v9 = vperm.slane %v513_v7, 0 }
  0xb9   : > { %682 = vtanh.f32 %v391_v28 }
  0xbd   : > { %v679_v32 = vpop.eup %678 }
  0xbe   : > { %v681_v33 = vpop.eup %680  ;;  %v407_v34 = vpack.c.bf16 %v679_v32, %v677_v31 }
  0xbf   : > { %v683_v36 = vpop.eup %682 }
  0xc0   : > { %455 = vmatpush.bf16.msra.mxu1 %v407_v34  ;;  %631 = vmatpush.bf16.msra.mxu2 %v407_v34  ;;  %v406_v37 = vpack.c.bf16 %v683_v36, %v681_v33 }
  0xc4   : > { %456 = vmatpush.bf16.msra.mxu1 %v406_v37  ;;  %632 = vmatpush.bf16.msra.mxu2 %v406_v37 }
  0xc7   : > { %621 = vmatmul.msk.bf16.vlgmr.msra.gmra.mxu1 %vm442_vm1, %v628_v38  ;;  %622 = vmatmul.msk.bf16.vlgmr.msra.gmra.mxu2 %vm442_vm1, %v629_v39 }
 0x144   : > { %v458_v41 = vpop.f32.mrf.mxu1 }
 0x145   : > { %v459_v43 = vadd.f32 %v458_v41, %v415_v40 }
 0x147   : > { %684 = vtanh.f32 %v459_v43 }
 0x14a   : > { %v463_v44 = vpop.f32.mrf.mxu2 }
 0x14b   : > { %v464_v47 = vadd.f32 %v463_v44, %v425_v45 }
 0x14c   : > { %v460_v46 = vpop.f32.mrf.mxu1 }
 0x14d   : > { %v461_v48 = vadd.f32 %v460_v46, %v420_v42  ;;  %v685_v52 = vpop.eup %684 }
 0x14e   : > { %v496_v56 = vmul.f32 %v685_v52, %v479_v50 }
 0x14f   : > { %686 = vtanh.f32 %v461_v48 }
 0x150   : > { %688 = vtanh.f32 %v464_v47 }
 0x152   : > { %v465_v51 = vpop.f32.mrf.mxu2 }
 0x153   : > { %v466_v53 = vadd.f32 %v465_v51, %v430_v49 }
 0x155   : > { %v687_v54 = vpop.eup %686  ;;  %690 = vtanh.f32 %v466_v53 }
 0x156   : > { %v497_v57 = vmul.f32 %v687_v54, %v484_v55  ;;  %v689_v58 = vpop.eup %688 }
 0x157   : > { %v498_v61 = vmul.f32 %v689_v58, %v489_v60 }
 0x158   : > { %v500_v59 = vadd.f32 %v497_v57, %v496_v56 }
 0x15a   : > { %v501_v1 = vadd.f32 %v500_v59, %v498_v61 }
 0x15b   : > { %v691_v62 = vpop.eup %690 }
 0x15c   : > { %v499_v0 = vmul.f32 %v691_v62, %v494_v63 }
 0x15e   : > { %v502_v2 = vadd.f32 %v501_v1, %v499_v0 }
 0x160   : > { %v503_v3 = vrot.slane %v502_v2, 4 }
 0x162   : > { %v504_v4 = vadd.f32 %v503_v3, %v502_v2 }
 0x164   : > { %v505_v5 = vrot.slane %v504_v4, 2 }
 0x166   : > { %v506_v6 = vadd.f32 %v505_v5, %v504_v4 }
 0x168   : > { %v507_v8 = vrot.slane %v506_v6, 1 }
 0x16a   : > { %v508_v10 = vadd.f32 %v507_v8, %v506_v6 }
 0x16c   : > { %v516_v11 = vadd.f32 %v515_v9, %v508_v10 }
 0x16e   : > { %517 = vst [vmem:[%s324_s16] sm:$0x1] %v516_v11 }
 0x16f   : > { %719 = shalt.err (!%p716_p5)
}
 0x170   : > { %633 = dma.vmem_to_hbm [thread:$0]  (%p838_p6), %s530_s17, 16, %s532_s18, %s519_s19  }
 0x171 PF: > { %s543_s25 = sand.u32 1, %s742_s26   ;;  %p636_p7 = pnand %p594_p9, %p842_p8 }
 0x172   : > { %s544_s9 = scalar_lea.sflag [#allocation5], %s543_s25 }
 0x173   : > { %p637_p10 = pneg %p636_p7 }
 0x175   : > { %737 = dma.done.wait (%p637_p10), %s544_s9, 16  }
 0x176   : > { %739 = vsyncadd (%p637_p10), %s544_s9, 4294967280  ;;  %p19_p11 = scmp.ge.s32.totalorder %s823_s8, 4   ;;  %s953_s26 = smov %s746_s27 }
 0x177   : > { %s954_s27 = smov %s750_s28  ;;  %s955_s28 = smov %s836_s11 }
 0x178   : > { %s956_s29 = smov %s823_s8  ;;  %21 = sbr.rel (!%p19_p11) target bundleno = 6 (0x6), region = 129 }
 0x17d   :  { %549 = vsyncpa [#allocation5], 1 }
 0x17e   :  { %551 = vsyncpa [#allocation5 + $0x1], 1 }

</bundles_post_ra>
